<compile_context>
chip_gen: v7x
topology: tpu7x:2x2x1
jax: 0.10.0
libtpu: 0.0.40
codegen_flags: <defaults>
</compile_context>

<pallas_src>
import functools
import math

import jax
import jax.numpy as jnp
from jax import lax
from jax.experimental import pallas as pl
from jax.experimental.pallas import tpu as pltpu

LN_EPS = 1e-5                      # torch.nn.LayerNorm default


# --------------------------- hardware-aware config ---------------------------
def _detect_vmem_bytes():
    """Physical VMEM per TensorCore (best effort, with safe fallbacks)."""
    try:
        info = pltpu.get_tpu_info()
        for name in ("vmem_capacity_bytes", "vmem_size_bytes", "vmem_bytes"):
            v = getattr(info, name, None)
            if isinstance(v, int) and v > 0:
                return v
    except Exception:
        pass
    try:
        kind = jax.devices()[0].device_kind.lower()
        if "v5" in kind or "v6" in kind:
            return 128 * 1024 * 1024
        if "v7" in kind or "tpu7" in kind or "7x" in kind:
            return 64 * 1024 * 1024
    except Exception:
        pass
    return 64 * 1024 * 1024        # conservative (v7x-class) default


_VMEM_PHYS = _detect_vmem_bytes()
_SMALL_VMEM = _VMEM_PHYS < 100 * 1024 * 1024     # v7x-class (64 MiB / core)

if _SMALL_VMEM:
    VMEM_LIMIT = 48 * 1024 * 1024
    TM_TARGET, TN_TARGET, TH_TARGET = 256, 512, 512
    TM_HEAD_TARGET, TV_TARGET = 256, 512
else:                                            # v5e / v6e: 128 MiB physical
    VMEM_LIMIT = 96 * 1024 * 1024
    TM_TARGET, TN_TARGET, TH_TARGET = 512, 1024, 1024
    TM_HEAD_TARGET, TV_TARGET = 512, 1024


def _probe_buffered1():
    """Verify pl.Buffered(1) single-buffered BlockSpecs lower and are correct."""
    try:
        def k(a_ref, b_ref, o_ref):
            o_ref[...] = a_ref[...] + b_ref[...]

        a = jnp.arange(16 * 128, dtype=jnp.float32).reshape(16, 128)
        b = 0.5 * jnp.arange(8 * 256, dtype=jnp.float32).reshape(8, 256)
        fn = pl.pallas_call(
            k,
            out_shape=jax.ShapeDtypeStruct((16, 256), jnp.float32),
            grid_spec=pltpu.PrefetchScalarGridSpec(
                num_scalar_prefetch=0,
                grid=(2, 2),
                in_specs=[
                    pl.BlockSpec((8, 128), lambda i, j: (i, 0),
                                 pipeline_mode=pl.Buffered(1)),
                    pl.BlockSpec((8, 128), lambda i, j: (0, j)),
                ],
                out_specs=pl.BlockSpec((8, 128), lambda i, j: (i, j)),
            ),
            compiler_params=pltpu.CompilerParams(
                dimension_semantics=("parallel", "arbitrary")),
        )
        got = jax.block_until_ready(fn(a, b))
        top = jnp.concatenate([a[:8] + b[:, :128], a[:8] + b[:, 128:]], axis=1)
        bot = jnp.concatenate([a[8:] + b[:, :128], a[8:] + b[:, 128:]], axis=1)
        return bool(jnp.allclose(got, jnp.concatenate([top, bot], axis=0)))
    except Exception:
        return False


# Single-buffering only pays off where VMEM is scarce (v7x-class chips).
_USE_BUFFERED1 = _SMALL_VMEM and _probe_buffered1()


def _bspec(shape, index_map, *, single=False):
    """BlockSpec; single=True -> single-buffer (block index constant along the
    inner grid axis, so the default double buffer is pure VMEM waste)."""
    if single and _USE_BUFFERED1:
        return pl.BlockSpec(shape, index_map, pipeline_mode=pl.Buffered(1))
    return pl.BlockSpec(shape, index_map)


def _pick_tile(dim, target, aligns=(16, 8)):
    """Largest tile <= target that is a multiple of one of `aligns` (tried in
    order) and divides `dim`.  Falls back to the full dim (always legal)."""
    if isinstance(aligns, int):
        aligns = (aligns,)
    if dim <= target:
        return dim
    for align in aligns:
        t = (target // align) * align
        while t >= align:
            if dim % t == 0:
                return t
            t -= align
    return dim


def _row_tile(T, target):
    tm = _pick_tile(T, target, (128, 16, 8))
    if _SMALL_VMEM and T // tm < 2:
        # v7x has 2 TensorCores sharded over the "parallel" row axis; prefer a
        # row grid of >= 2 so both cores get work.
        smaller = _pick_tile(T, max(T // 2, 16), (128, 16, 8))
        if T // smaller >= 2:
            tm = smaller
    return tm


# ----------------------------- in-kernel helpers -----------------------------
def _layernorm(x, gamma):
    mean = jnp.mean(x, axis=-1, keepdims=True)
    var = jnp.mean((x - mean) ** 2, axis=-1, keepdims=True)
    return (x - mean) * lax.rsqrt(var + LN_EPS) * gamma


def _gelu_exact(x):
    # torch.nn.GELU() default = exact erf formulation (kept in f32 on the VPU)
    return 0.5 * x * (1.0 + lax.erf(x * (1.0 / math.sqrt(2.0))))


# ---------- Kernel A: first_ln + state_matrices_up + scale + identity --------
def _up_kernel(x_ref, g1_ref, w_ref, eye_ref, u_ref, xn_ref, *, scale):
    # Cache layernorm(x) (bf16) once per row tile, reuse for every column tile.
    @pl.when(pl.program_id(1) == 0)
    def _():
        xn_ref[...] = _layernorm(x_ref[...], g1_ref[...]).astype(jnp.bfloat16)

    u = jnp.dot(xn_ref[...], w_ref[...], preferred_element_type=jnp.float32)
    u_ref[...] = u * scale + eye_ref[...]        # fused "* scale + I"


def up_proj_newmats(x, g1, wup_t, eye_flat, scale):
    T, E = x.shape
    S = wup_t.shape[1]
    tm = _row_tile(T, TM_TARGET)
    tn = _pick_tile(S, TN_TARGET, (128,))
    grid = (T // tm, S // tn)
    return pl.pallas_call(
        functools.partial(_up_kernel, scale=scale),
        out_shape=jax.ShapeDtypeStruct((T, S), jnp.float32),
        grid_spec=pltpu.PrefetchScalarGridSpec(
            num_scalar_prefetch=0,
            grid=grid,
            in_specs=[
                _bspec((tm, E), lambda i, j: (i, 0), single=True),   # activations
                _bspec((1, E), lambda i, j: (0, 0), single=True),    # first_ln weight
                pl.BlockSpec((E, tn), lambda i, j: (0, j)),          # up-proj weight
                pl.BlockSpec((1, tn), lambda i, j: (0, j)),          # flattened identity
            ],
            out_specs=pl.BlockSpec((tm, tn), lambda i, j: (i, j)),
            scratch_shapes=[pltpu.VMEM((tm, E), jnp.bfloat16)],      # ln(x) cache
        ),
        compiler_params=pltpu.CompilerParams(
            dimension_semantics=("parallel", "arbitrary"),
            vmem_limit_bytes=VMEM_LIMIT),
    )(x, g1, wup_t, eye_flat)


# -- Kernel B: folded down+mru_out, residual, second_ln, GELU MLP, residual ---
def _tail_kernel(sf_ref, x_ref, wmru_ref, g2_ref, wfc1_ref, wfc2_ref, y_ref,
                 an_ref):
    j = pl.program_id(1)

    @pl.when(j == 0)
    def _():
        mru = jnp.dot(sf_ref[...].astype(jnp.bfloat16), wmru_ref[...],
                      preferred_element_type=jnp.float32)
        a = x_ref[...] + mru                                 # activations + mru_out
        y_ref[...] = a                                       # resident accumulator
        an_ref[...] = _layernorm(a, g2_ref[...]).astype(jnp.bfloat16)  # second_ln

    # MLP with the 4E hidden dim tiled as a reduction (grid axis 1); accumulate
    # straight into the resident output block (no VMEM scratch / final copy).
    h = _gelu_exact(jnp.dot(an_ref[...], wfc1_ref[...],
                            preferred_element_type=jnp.float32))
    y_ref[...] += jnp.dot(h.astype(jnp.bfloat16), wfc2_ref[...],
                          preferred_element_type=jnp.float32)


def block_tail(states_flat, x, p):
    T, E = x.shape
    S = states_flat.shape[1]
    F = p["wfc1_t"].shape[1]                     # 4 * E
    tm = _row_tile(T, TM_TARGET)
    th = _pick_tile(F, TH_TARGET, (128,))
    grid = (T // tm, F // th)
    return pl.pallas_call(
        _tail_kernel,
        out_shape=jax.ShapeDtypeStruct((T, E), jnp.float32),
        grid_spec=pltpu.PrefetchScalarGridSpec(
            num_scalar_prefetch=0,
            grid=grid,
            in_specs=[
                _bspec((tm, S), lambda i, j: (i, 0), single=True),  # states_flat
                _bspec((tm, E), lambda i, j: (i, 0), single=True),  # x (aliased w/ y)
                _bspec((S, E), lambda i, j: (0, 0), single=True),   # folded down@mru_out
                _bspec((1, E), lambda i, j: (0, 0), single=True),   # second_ln weight
                pl.BlockSpec((E, th), lambda i, j: (0, j)),         # mlp fc1 (hidden tile)
                pl.BlockSpec((th, E), lambda i, j: (j, 0)),         # mlp fc2 (hidden tile)
            ],
            out_specs=pl.BlockSpec((tm, E), lambda i, j: (i, 0)),
            scratch_shapes=[pltpu.VMEM((tm, E), jnp.bfloat16)],     # ln(a), bf16 once
        ),
        compiler_params=pltpu.CompilerParams(
            dimension_semantics=("parallel", "arbitrary"),
            vmem_limit_bytes=VMEM_LIMIT),
        input_output_aliases={1: 0},   # write the residual stream in place
    )(states_flat, x, p["wmru"], p["g2"], p["wfc1_t"], p["wfc2_t"])


# ------------------------------ Kernel C: LM head -----------------------------
def _lm_head_kernel(x_ref, w_ref, o_ref):
    o_ref[...] = jnp.dot(x_ref[...].astype(jnp.bfloat16), w_ref[...],
                         preferred_element_type=jnp.float32)


def lm_head(x, wte_t):
    T, E = x.shape
    V = wte_t.shape[1]
    # Large tm => wte_t is re-streamed (T/tm) times; keep it as big as VMEM allows.
    tm = _row_tile(T, TM_HEAD_TARGET)
    tv = _pick_tile(V, TV_TARGET, (128,))     # lane-dense logits tiles
    grid = (T // tm, V // tv)
    return pl.pallas_call(
        _lm_head_kernel,
        # f32 logits preserved to match the reference module's output dtype.
        out_shape=jax.ShapeDtypeStruct((T, V), jnp.float32),
        grid_spec=pltpu.PrefetchScalarGridSpec(
            num_scalar_prefetch=0,
            grid=grid,
            in_specs=[_bspec((tm, E), lambda i, j: (i, 0), single=True),
                      pl.BlockSpec((E, tv), lambda i, j: (0, j))],
            out_specs=pl.BlockSpec((tm, tv), lambda i, j: (i, j)),
        ),
        compiler_params=pltpu.CompilerParams(
            dimension_semantics=("parallel", "arbitrary"),
            vmem_limit_bytes=VMEM_LIMIT),
    )(x, wte_t)


# ------------------------------ JAX glue / scan -------------------------------
def parallel_mru_op(mats):
    # TODO(synk): `parallel_mru_op` is not defined in the reference source;
    # implemented as the inclusive left-to-right cumulative matrix product
    # along the sequence axis (state_t = M_0 @ M_1 @ ... @ M_t).
    # TODO(synk): for long T this log(T)-pass scan round-trips (T,S) through
    # HBM; a Pallas chunked-scan carrying the (H,r,r) product across row tiles
    # would remove that, but the tiny r x r trailing dims lay out poorly on the
    # (8,128) vreg tiling, so it stays in plain JAX here.
    return lax.associative_scan(
        lambda a, b: jnp.einsum("...ij,...jk->...ik", a, b), mats, axis=0)


def block_forward(x, p, last_state, cfg):
    T, E = x.shape
    H = cfg["n_state_heads"]
    S = cfg["state_size"]
    r = math.isqrt(S // H)
    scale = 0.08 * (1.0 / r)

    # fused: first_ln -> state_matrices_up -> * scale + per-head identity
    u = up_proj_newmats(x, p["g1"], p["wup_t"], p["eye_flat"], scale)   # (T, S)
    new_mats = u.reshape(T, H, r, r)
    if last_state is None:
        full = new_mats
    else:
        full = jnp.concatenate([last_state[None], new_mats], axis=0)
    states = parallel_mru_op(full)                                      # (T[+1], H, r, r)
    if last_state is not None:
        states = states[1:]
    states_flat = states.reshape(T, S)
    y = block_tail(states_flat, x, p)                                   # (T, E)
    return y, states[-1]                                                # (H, r, r)


def mru_lm_forward(encodings, wte, wte_t, blocks, cfg, last_state=None):
    # dropout is identity in eval mode (training=False)
    x = jnp.take(wte, encodings, axis=0)                                # (T, E)
    if last_state is None:
        last_state = [None] * len(blocks)
    new_states = []
    for p, s in zip(blocks, last_state):
        x, ns = block_forward(x, p, s, cfg)
        new_states.append(ns)
    logits = lm_head(x, wte_t)                                          # (T, V)
    return logits, new_states


# ------------------------------- parameter init -------------------------------
def init_params(key, cfg):
    V, E = cfg["vocab_size"], cfg["embedding_size"]
    H, S = cfg["n_state_heads"], cfg["state_size"]
    n_blocks = cfg["n_blocks"]
    r = math.isqrt(S // H)
    C = E // (r * H)

    keys = jax.random.split(key, 1 + 5 * n_blocks)
    wte = 0.02 * jax.random.normal(keys[0], (V, E), jnp.float32)
    wte_t = wte.T.astype(jnp.bfloat16)       # pre-transposed LM head weight (once)

    # 1.0 at the per-head diagonal positions of the flattened (H, r, r) layout.
    eye_flat = jnp.tile(jnp.eye(r, dtype=jnp.float32).reshape(-1), H).reshape(1, S)

    blocks = []
    for b in range(n_blocks):
        k = keys[1 + 5 * b: 1 + 5 * (b + 1)]
        # NOTE: torch zero-inits state_matrices_up; a small normal is used so
        # the recurrence is exercised (forward semantics are unchanged).
        w_up = 0.02 * jax.random.normal(k[0], (S, E), jnp.float32)
        down = (0.02 * math.sqrt(E)) * jax.random.normal(k[1], (H, r, C), jnp.float32)
        w_out = (0.02 / math.sqrt(2 * n_blocks)) * jax.random.normal(k[2], (E, E), jnp.float32)
        w_fc1 = 0.02 * jax.random.normal(k[3], (4 * E, E), jnp.float32)
        w_fc2 = (0.02 / math.sqrt(2 * n_blocks)) * jax.random.normal(k[4], (E, 4 * E), jnp.float32)

        # Fold the block-sparse per-head down projection into mru_out at init:
        # (states @ down).flatten(-3,-1) @ w_out.T == states_flat @ (wdown_big @ w_out.T)
        wdown_big = jnp.einsum("hx,iy,hjc->hijxyc",
                               jnp.eye(H, dtype=jnp.float32),
                               jnp.eye(r, dtype=jnp.float32),
                               down).reshape(S, E)
        wmru = (wdown_big @ w_out.T).astype(jnp.bfloat16)

        blocks.append(dict(
            wup_t=w_up.T.astype(jnp.bfloat16),    # (E, S)
            wmru=wmru,                            # (S, E) folded down @ mru_out
            wfc1_t=w_fc1.T.astype(jnp.bfloat16),  # (E, 4E)
            wfc2_t=w_fc2.T.astype(jnp.bfloat16),  # (4E, E)
            g1=jnp.ones((1, E), jnp.float32),     # first_ln weight (no bias)
            g2=jnp.ones((1, E), jnp.float32),     # second_ln weight (no bias)
            eye_flat=eye_flat,                    # (1, S)
        ))
    return wte, wte_t, blocks


# ------------------------------------ main ------------------------------------
if __name__ == "__main__":
    cfg = dict(vocab_size=64, embedding_size=32, dropout_rate=0.0,
               n_state_heads=2, state_size=32, n_blocks=2)
    T = 8

    key = jax.random.PRNGKey(0)
    k_enc, k_par = jax.random.split(key)
    encodings = jax.random.randint(k_enc, (T,), 0, cfg["vocab_size"], dtype=jnp.int32)
    wte, wte_t, blocks = init_params(k_par, cfg)

    fwd = jax.jit(lambda enc, w, wt, blks: mru_lm_forward(enc, w, wt, blks, cfg))
    logits, new_states = fwd(encodings, wte, wte_t, blocks)
    logits = jax.block_until_ready(logits)
    for s in new_states:
        jax.block_until_ready(s)

    r = math.isqrt(cfg["state_size"] // cfg["n_state_heads"])
    assert logits.shape == (T, cfg["vocab_size"])
    assert all(s.shape == (cfg["n_state_heads"], r, r) for s in new_states)
    print("KERNEL_OK")
</pallas_src>

<mosaic_0001>
module attributes {stable_mosaic.version = 11 : i64} {
  func.func @k(%arg0: i32, %arg1: i32, %arg2: memref<8x128xf32, #tpu.memory_space<vmem>>, %arg3: memref<8x128xf32, #tpu.memory_space<vmem>>, %arg4: memref<8x128xf32, #tpu.memory_space<vmem>>) attributes {dimension_semantics = [#tpu.dimension_semantics<parallel>, #tpu.dimension_semantics<arbitrary>], iteration_bounds = array<i64: 2, 2>, scalar_prefetch = 0 : i64, scratch_operands = 0 : i64, tpu.core_type = #tpu.core_type<tc>, window_params = [{pipeline_mode = #tpu.pipeline_mode<synchronous>, transform_indices = @transform_0, window_bounds = array<i64: 8, 128>}, {transform_indices = @transform_1, window_bounds = array<i64: 8, 128>}, {transform_indices = @transform_2, window_bounds = array<i64: 8, 128>}]} {
    %c0 = arith.constant 0 : index
    %c0_0 = arith.constant 0 : index
    %0 = vector.load %arg2[%c0, %c0_0] : memref<8x128xf32, #tpu.memory_space<vmem>>, vector<8x128xf32>
    %c0_1 = arith.constant 0 : index
    %c0_2 = arith.constant 0 : index
    %1 = vector.load %arg3[%c0_1, %c0_2] : memref<8x128xf32, #tpu.memory_space<vmem>>, vector<8x128xf32>
    %2 = arith.addf %0, %1 : vector<8x128xf32>
    %c0_3 = arith.constant 0 : index
    %c0_4 = arith.constant 0 : index
    %3 = vector.load %arg4[%c0_3, %c0_4] : memref<8x128xf32, #tpu.memory_space<vmem>>, vector<8x128xf32>
    tpu.vector_store %arg4[%c0_3, %c0_4], %2 {strides = array<i32>} : memref<8x128xf32, #tpu.memory_space<vmem>>, vector<8x128xf32>,
    return
  }
  func.func @transform_0(%arg0: i32, %arg1: i32) -> (i32, i32) {
    %c0_i32 = arith.constant 0 : i32
    %c0_i32_0 = arith.constant 0 : i32
    return %arg0, %c0_i32 : i32, i32
  }
  func.func @transform_1(%arg0: i32, %arg1: i32) -> (i32, i32) {
    %c0_i32 = arith.constant 0 : i32
    %c0_i32_0 = arith.constant 0 : i32
    return %c0_i32, %arg1 : i32, i32
  }
  func.func @transform_2(%arg0: i32, %arg1: i32) -> (i32, i32) {
    %c0_i32 = arith.constant 0 : i32
    return %arg0, %arg1 : i32, i32
  }
}

module attributes {stable_mosaic.version = 11 : i64} {
  func.func @_up_kernel(%arg0: i32, %arg1: i32, %arg2: memref<8x32xf32, #tpu.memory_space<vmem>>, %arg3: memref<1x32xf32, #tpu.memory_space<vmem>>, %arg4: memref<32x32xbf16, #tpu.memory_space<vmem>>, %arg5: memref<1x32xf32, #tpu.memory_space<vmem>>, %arg6: memref<8x32xf32, #tpu.memory_space<vmem>>, %arg7: memref<8x32xbf16, #tpu.memory_space<vmem>>) attributes {dimension_semantics = [#tpu.dimension_semantics<parallel>, #tpu.dimension_semantics<arbitrary>], iteration_bounds = array<i64: 1, 1>, scalar_prefetch = 0 : i64, scratch_operands = 1 : i64, tpu.core_type = #tpu.core_type<tc>, window_params = [{transform_indices = @transform_0, window_bounds = array<i64: 8, 32>}, {pipeline_mode = #tpu.pipeline_mode<synchronous>, transform_indices = @transform_1, window_bounds = array<i64: 1, 32>}, {transform_indices = @transform_2, window_bounds = array<i64: 32, 32>}, {transform_indices = @transform_3, window_bounds = array<i64: 1, 32>}, {transform_indices = @transform_4, window_bounds = array<i64: 8, 32>}]} {
    %c0_i32 = arith.constant 0 : i32
    %0 = arith.cmpi eq, %arg1, %c0_i32 : i32
    %1 = arith.extui %0 : i1 to i32
    %c0_i32_0 = arith.constant 0 : i32
    %2 = arith.cmpi ne, %1, %c0_i32_0 : i32
    scf.if %2 {
      %c0_9 = arith.constant 0 : index
      %c0_10 = arith.constant 0 : index
      %12 = vector.load %arg2[%c0_9, %c0_10] : memref<8x32xf32, #tpu.memory_space<vmem>>, vector<8x32xf32>
      %c0_11 = arith.constant 0 : index
      %c0_12 = arith.constant 0 : index
      %13 = vector.load %arg3[%c0_11, %c0_12] : memref<1x32xf32, #tpu.memory_space<vmem>>, vector<1x32xf32>
      %cst_13 = arith.constant dense<0.000000e+00> : vector<8xf32>
      %14 = vector.multi_reduction <add>, %12, %cst_13 [1] : vector<8x32xf32> to vector<8xf32>
      %15 = vector.shape_cast %14 : vector<8xf32> to vector<8x1xf32>
      %cst_14 = arith.constant 3.200000e+01 : f32
      %16 = vector.broadcast %cst_14 : f32 to vector<8x1xf32>
      %17 = arith.divf %15, %16 : vector<8x1xf32>
      %18 = vector.broadcast %17 : vector<8x1xf32> to vector<8x32xf32>
      %19 = arith.subf %12, %18 : vector<8x32xf32>
      %20 = arith.mulf %19, %19 : vector<8x32xf32>
      %cst_15 = arith.constant dense<0.000000e+00> : vector<8xf32>
      %21 = vector.multi_reduction <add>, %20, %cst_15 [1] : vector<8x32xf32> to vector<8xf32>
      %22 = vector.shape_cast %21 : vector<8xf32> to vector<8x1xf32>
      %cst_16 = arith.constant 3.200000e+01 : f32
      %23 = vector.broadcast %cst_16 : f32 to vector<8x1xf32>
      %24 = arith.divf %22, %23 : vector<8x1xf32>
      %25 = vector.broadcast %17 : vector<8x1xf32> to vector<8x32xf32>
      %26 = arith.subf %12, %25 : vector<8x32xf32>
      %cst_17 = arith.constant 9.99999974E-6 : f32
      %27 = vector.broadcast %cst_17 : f32 to vector<8x1xf32>
      %28 = arith.addf %24, %27 : vector<8x1xf32>
      %29 = math.rsqrt %28 : vector<8x1xf32>
      %30 = vector.broadcast %29 : vector<8x1xf32> to vector<8x32xf32>
      %31 = arith.mulf %26, %30 : vector<8x32xf32>
      %32 = vector.broadcast %13 : vector<1x32xf32> to vector<8x32xf32>
      %33 = arith.mulf %31, %32 : vector<8x32xf32>
      %34 = arith.truncf %33 : vector<8x32xf32> to vector<8x32xbf16>
      %c0_18 = arith.constant 0 : index
      %c0_19 = arith.constant 0 : index
      %35 = vector.load %arg7[%c0_18, %c0_19] : memref<8x32xbf16, #tpu.memory_space<vmem>>, vector<8x32xbf16>
      tpu.vector_store %arg7[%c0_18, %c0_19], %34 {strides = array<i32>} : memref<8x32xbf16, #tpu.memory_space<vmem>>, vector<8x32xbf16>,
    } else {
    }
    %c0 = arith.constant 0 : index
    %c0_1 = arith.constant 0 : index
    %3 = vector.load %arg7[%c0, %c0_1] : memref<8x32xbf16, #tpu.memory_space<vmem>>, vector<8x32xbf16>
    %c0_2 = arith.constant 0 : index
    %c0_3 = arith.constant 0 : index
    %4 = vector.load %arg4[%c0_2, %c0_3] : memref<32x32xbf16, #tpu.memory_space<vmem>>, vector<32x32xbf16>
    %cst = arith.constant dense<0.000000e+00> : vector<8x32xf32>
    %5 = tpu.matmul %3, %4, %cst {dimension_numbers = #tpu.dot_dimension_numbers<[1], [0], [0], [1], [0, 0, 1, 1], [], []>} : vector<8x32xbf16>, vector<32x32xbf16>, vector<8x32xf32> -> vector<8x32xf32>
    %cst_4 = arith.constant 2.000000e-02 : f32
    %6 = vector.broadcast %cst_4 : f32 to vector<8x32xf32>
    %7 = arith.mulf %5, %6 : vector<8x32xf32>
    %c0_5 = arith.constant 0 : index
    %c0_6 = arith.constant 0 : index
    %8 = vector.load %arg5[%c0_5, %c0_6] : memref<1x32xf32, #tpu.memory_space<vmem>>, vector<1x32xf32>
    %9 = vector.broadcast %8 : vector<1x32xf32> to vector<8x32xf32>
    %10 = arith.addf %7, %9 : vector<8x32xf32>
    %c0_7 = arith.constant 0 : index
    %c0_8 = arith.constant 0 : index
    %11 = vector.load %arg6[%c0_7, %c0_8] : memref<8x32xf32, #tpu.memory_space<vmem>>, vector<8x32xf32>
    tpu.vector_store %arg6[%c0_7, %c0_8], %10 {strides = array<i32>} : memref<8x32xf32, #tpu.memory_space<vmem>>, vector<8x32xf32>,
    return
  }
  func.func @transform_0(%arg0: i32, %arg1: i32) -> (i32, i32) {
    %c0_i32 = arith.constant 0 : i32
    %c0_i32_0 = arith.constant 0 : i32
    return %arg0, %c0_i32 : i32, i32
  }
  func.func @transform_1(%arg0: i32, %arg1: i32) -> (i32, i32) {
    %c0_i32 = arith.constant 0 : i32
    %c0_i32_0 = arith.constant 0 : i32
    %c0_i32_1 = arith.constant 0 : i32
    return %c0_i32, %c0_i32_0 : i32, i32
  }
  func.func @transform_2(%arg0: i32, %arg1: i32) -> (i32, i32) {
    %c0_i32 = arith.constant 0 : i32
    %c0_i32_0 = arith.constant 0 : i32
    return %c0_i32, %arg1 : i32, i32
  }
  func.func @transform_3(%arg0: i32, %arg1: i32) -> (i32, i32) {
    %c0_i32 = arith.constant 0 : i32
    %c0_i32_0 = arith.constant 0 : i32
    return %c0_i32, %arg1 : i32, i32
  }
  func.func @transform_4(%arg0: i32, %arg1: i32) -> (i32, i32) {
    %c0_i32 = arith.constant 0 : i32
    return %arg0, %arg1 : i32, i32
  }
}

module attributes {stable_mosaic.version = 11 : i64} {
  func.func @_lm_head_kernel(%arg0: i32, %arg1: i32, %arg2: memref<8x32xf32, #tpu.memory_space<vmem>>, %arg3: memref<32x64xbf16, #tpu.memory_space<vmem>>, %arg4: memref<8x64xf32, #tpu.memory_space<vmem>>) attributes {dimension_semantics = [#tpu.dimension_semantics<parallel>, #tpu.dimension_semantics<arbitrary>], iteration_bounds = array<i64: 1, 1>, scalar_prefetch = 0 : i64, scratch_operands = 0 : i64, tpu.core_type = #tpu.core_type<tc>, window_params = [{transform_indices = @transform_0, window_bounds = array<i64: 8, 32>}, {transform_indices = @transform_1, window_bounds = array<i64: 32, 64>}, {transform_indices = @transform_2, window_bounds = array<i64: 8, 64>}]} {
    %c0 = arith.constant 0 : index
    %c0_0 = arith.constant 0 : index
    %0 = vector.load %arg2[%c0, %c0_0] : memref<8x32xf32, #tpu.memory_space<vmem>>, vector<8x32xf32>
    %1 = arith.truncf %0 : vector<8x32xf32> to vector<8x32xbf16>
    %c0_1 = arith.constant 0 : index
    %c0_2 = arith.constant 0 : index
    %2 = vector.load %arg3[%c0_1, %c0_2] : memref<32x64xbf16, #tpu.memory_space<vmem>>, vector<32x64xbf16>
    %cst = arith.constant dense<0.000000e+00> : vector<8x64xf32>
    %3 = tpu.matmul %1, %2, %cst {dimension_numbers = #tpu.dot_dimension_numbers<[1], [0], [0], [1], [0, 0, 1, 1], [], []>} : vector<8x32xbf16>, vector<32x64xbf16>, vector<8x64xf32> -> vector<8x64xf32>
    %c0_3 = arith.constant 0 : index
    %c0_4 = arith.constant 0 : index
    %4 = vector.load %arg4[%c0_3, %c0_4] : memref<8x64xf32, #tpu.memory_space<vmem>>, vector<8x64xf32>
    tpu.vector_store %arg4[%c0_3, %c0_4], %3 {strides = array<i32>} : memref<8x64xf32, #tpu.memory_space<vmem>>, vector<8x64xf32>,
    return
  }
  func.func @transform_0(%arg0: i32, %arg1: i32) -> (i32, i32) {
    %c0_i32 = arith.constant 0 : i32
    %c0_i32_0 = arith.constant 0 : i32
    return %arg0, %c0_i32 : i32, i32
  }
  func.func @transform_1(%arg0: i32, %arg1: i32) -> (i32, i32) {
    %c0_i32 = arith.constant 0 : i32
    %c0_i32_0 = arith.constant 0 : i32
    return %c0_i32, %arg1 : i32, i32
  }
  func.func @transform_2(%arg0: i32, %arg1: i32) -> (i32, i32) {
    %c0_i32 = arith.constant 0 : i32
    return %arg0, %arg1 : i32, i32
  }
}

module attributes {stable_mosaic.version = 11 : i64} {
  func.func @_tail_kernel(%arg0: i32, %arg1: i32, %arg2: memref<8x32xf32, #tpu.memory_space<vmem>>, %arg3: memref<8x32xf32, #tpu.memory_space<vmem>>, %arg4: memref<32x32xbf16, #tpu.memory_space<vmem>>, %arg5: memref<1x32xf32, #tpu.memory_space<vmem>>, %arg6: memref<32x128xbf16, #tpu.memory_space<vmem>>, %arg7: memref<128x32xbf16, #tpu.memory_space<vmem>>, %arg8: memref<8x32xf32, #tpu.memory_space<vmem>>, %arg9: memref<8x32xbf16, #tpu.memory_space<vmem>>) attributes {dimension_semantics = [#tpu.dimension_semantics<parallel>, #tpu.dimension_semantics<arbitrary>], iteration_bounds = array<i64: 1, 1>, scalar_prefetch = 0 : i64, scratch_operands = 1 : i64, tpu.core_type = #tpu.core_type<tc>, window_params = [{transform_indices = @transform_0, window_bounds = array<i64: 8, 32>}, {transform_indices = @transform_1, window_bounds = array<i64: 8, 32>}, {pipeline_mode = #tpu.pipeline_mode<synchronous>, transform_indices = @transform_2, window_bounds = array<i64: 32, 32>}, {pipeline_mode = #tpu.pipeline_mode<synchronous>, transform_indices = @transform_3, window_bounds = array<i64: 1, 32>}, {transform_indices = @transform_4, window_bounds = array<i64: 32, 128>}, {transform_indices = @transform_5, window_bounds = array<i64: 128, 32>}, {transform_indices = @transform_6, window_bounds = array<i64: 8, 32>}]} {
    %c0_i32 = arith.constant 0 : i32
    %0 = arith.cmpi eq, %arg1, %c0_i32 : i32
    %1 = arith.extui %0 : i1 to i32
    %c0_i32_0 = arith.constant 0 : i32
    %2 = arith.cmpi ne, %1, %c0_i32_0 : i32
    scf.if %2 {
      %c0_14 = arith.constant 0 : index
      %c0_15 = arith.constant 0 : index
      %20 = vector.load %arg2[%c0_14, %c0_15] : memref<8x32xf32, #tpu.memory_space<vmem>>, vector<8x32xf32>
      %21 = arith.truncf %20 : vector<8x32xf32> to vector<8x32xbf16>
      %c0_16 = arith.constant 0 : index
      %c0_17 = arith.constant 0 : index
      %22 = vector.load %arg4[%c0_16, %c0_17] : memref<32x32xbf16, #tpu.memory_space<vmem>>, vector<32x32xbf16>
      %cst_18 = arith.constant dense<0.000000e+00> : vector<8x32xf32>
      %23 = tpu.matmul %21, %22, %cst_18 {dimension_numbers = #tpu.dot_dimension_numbers<[1], [0], [0], [1], [0, 0, 1, 1], [], []>} : vector<8x32xbf16>, vector<32x32xbf16>, vector<8x32xf32> -> vector<8x32xf32>
      %c0_19 = arith.constant 0 : index
      %c0_20 = arith.constant 0 : index
      %24 = vector.load %arg3[%c0_19, %c0_20] : memref<8x32xf32, #tpu.memory_space<vmem>>, vector<8x32xf32>
      %25 = arith.addf %24, %23 : vector<8x32xf32>
      %c0_21 = arith.constant 0 : index
      %c0_22 = arith.constant 0 : index
      %26 = vector.load %arg8[%c0_21, %c0_22] : memref<8x32xf32, #tpu.memory_space<vmem>>, vector<8x32xf32>
      tpu.vector_store %arg8[%c0_21, %c0_22], %25 {strides = array<i32>} : memref<8x32xf32, #tpu.memory_space<vmem>>, vector<8x32xf32>,
      %c0_23 = arith.constant 0 : index
      %c0_24 = arith.constant 0 : index
      %27 = vector.load %arg5[%c0_23, %c0_24] : memref<1x32xf32, #tpu.memory_space<vmem>>, vector<1x32xf32>
      %cst_25 = arith.constant dense<0.000000e+00> : vector<8xf32>
      %28 = vector.multi_reduction <add>, %25, %cst_25 [1] : vector<8x32xf32> to vector<8xf32>
      %29 = vector.shape_cast %28 : vector<8xf32> to vector<8x1xf32>
      %cst_26 = arith.constant 3.200000e+01 : f32
      %30 = vector.broadcast %cst_26 : f32 to vector<8x1xf32>
      %31 = arith.divf %29, %30 : vector<8x1xf32>
      %32 = vector.broadcast %31 : vector<8x1xf32> to vector<8x32xf32>
      %33 = arith.subf %25, %32 : vector<8x32xf32>
      %34 = arith.mulf %33, %33 : vector<8x32xf32>
      %cst_27 = arith.constant dense<0.000000e+00> : vector<8xf32>
      %35 = vector.multi_reduction <add>, %34, %cst_27 [1] : vector<8x32xf32> to vector<8xf32>
      %36 = vector.shape_cast %35 : vector<8xf32> to vector<8x1xf32>
      %cst_28 = arith.constant 3.200000e+01 : f32
      %37 = vector.broadcast %cst_28 : f32 to vector<8x1xf32>
      %38 = arith.divf %36, %37 : vector<8x1xf32>
      %39 = vector.broadcast %31 : vector<8x1xf32> to vector<8x32xf32>
      %40 = arith.subf %25, %39 : vector<8x32xf32>
      %cst_29 = arith.constant 9.99999974E-6 : f32
      %41 = vector.broadcast %cst_29 : f32 to vector<8x1xf32>
      %42 = arith.addf %38, %41 : vector<8x1xf32>
      %43 = math.rsqrt %42 : vector<8x1xf32>
      %44 = vector.broadcast %43 : vector<8x1xf32> to vector<8x32xf32>
      %45 = arith.mulf %40, %44 : vector<8x32xf32>
      %46 = vector.broadcast %27 : vector<1x32xf32> to vector<8x32xf32>
      %47 = arith.mulf %45, %46 : vector<8x32xf32>
      %48 = arith.truncf %47 : vector<8x32xf32> to vector<8x32xbf16>
      %c0_30 = arith.constant 0 : index
      %c0_31 = arith.constant 0 : index
      %49 = vector.load %arg9[%c0_30, %c0_31] : memref<8x32xbf16, #tpu.memory_space<vmem>>, vector<8x32xbf16>
      tpu.vector_store %arg9[%c0_30, %c0_31], %48 {strides = array<i32>} : memref<8x32xbf16, #tpu.memory_space<vmem>>, vector<8x32xbf16>,
    } else {
    }
    %c0 = arith.constant 0 : index
    %c0_1 = arith.constant 0 : index
    %3 = vector.load %arg9[%c0, %c0_1] : memref<8x32xbf16, #tpu.memory_space<vmem>>, vector<8x32xbf16>
    %c0_2 = arith.constant 0 : index
    %c0_3 = arith.constant 0 : index
    %4 = vector.load %arg6[%c0_2, %c0_3] : memref<32x128xbf16, #tpu.memory_space<vmem>>, vector<32x128xbf16>
    %cst = arith.constant dense<0.000000e+00> : vector<8x128xf32>
    %5 = tpu.matmul %3, %4, %cst {dimension_numbers = #tpu.dot_dimension_numbers<[1], [0], [0], [1], [0, 0, 1, 1], [], []>} : vector<8x32xbf16>, vector<32x128xbf16>, vector<8x128xf32> -> vector<8x128xf32>
    %cst_4 = arith.constant 5.000000e-01 : f32
    %6 = vector.broadcast %cst_4 : f32 to vector<8x128xf32>
    %7 = arith.mulf %6, %5 : vector<8x128xf32>
    %cst_5 = arith.constant 0.707106769 : f32
    %8 = vector.broadcast %cst_5 : f32 to vector<8x128xf32>
    %9 = arith.mulf %5, %8 : vector<8x128xf32>
    %10 = math.erf %9 : vector<8x128xf32>
    %cst_6 = arith.constant 1.000000e+00 : f32
    %11 = vector.broadcast %cst_6 : f32 to vector<8x128xf32>
    %12 = arith.addf %11, %10 : vector<8x128xf32>
    %13 = arith.mulf %7, %12 : vector<8x128xf32>
    %c0_7 = arith.constant 0 : index
    %c0_8 = arith.constant 0 : index
    %14 = vector.load %arg8[%c0_7, %c0_8] : memref<8x32xf32, #tpu.memory_space<vmem>>, vector<8x32xf32>
    %15 = arith.truncf %13 : vector<8x128xf32> to vector<8x128xbf16>
    %c0_9 = arith.constant 0 : index
    %c0_10 = arith.constant 0 : index
    %16 = vector.load %arg7[%c0_9, %c0_10] : memref<128x32xbf16, #tpu.memory_space<vmem>>, vector<128x32xbf16>
    %cst_11 = arith.constant dense<0.000000e+00> : vector<8x32xf32>
    %17 = tpu.matmul %15, %16, %cst_11 {dimension_numbers = #tpu.dot_dimension_numbers<[1], [0], [0], [1], [0, 0, 1, 1], [], []>} : vector<8x128xbf16>, vector<128x32xbf16>, vector<8x32xf32> -> vector<8x32xf32>
    %18 = arith.addf %14, %17 : vector<8x32xf32>
    %c0_12 = arith.constant 0 : index
    %c0_13 = arith.constant 0 : index
    %19 = vector.load %arg8[%c0_12, %c0_13] : memref<8x32xf32, #tpu.memory_space<vmem>>, vector<8x32xf32>
    tpu.vector_store %arg8[%c0_12, %c0_13], %18 {strides = array<i32>} : memref<8x32xf32, #tpu.memory_space<vmem>>, vector<8x32xf32>,
    return
  }
  func.func @transform_0(%arg0: i32, %arg1: i32) -> (i32, i32) {
    %c0_i32 = arith.constant 0 : i32
    %c0_i32_0 = arith.constant 0 : i32
    return %arg0, %c0_i32 : i32, i32
  }
  func.func @transform_1(%arg0: i32, %arg1: i32) -> (i32, i32) {
    %c0_i32 = arith.constant 0 : i32
    %c0_i32_0 = arith.constant 0 : i32
    return %arg0, %c0_i32 : i32, i32
  }
  func.func @transform_2(%arg0: i32, %arg1: i32) -> (i32, i32) {
    %c0_i32 = arith.constant 0 : i32
    %c0_i32_0 = arith.constant 0 : i32
    %c0_i32_1 = arith.constant 0 : i32
    return %c0_i32, %c0_i32_0 : i32, i32
  }
  func.func @transform_3(%arg0: i32, %arg1: i32) -> (i32, i32) {
    %c0_i32 = arith.constant 0 : i32
    %c0_i32_0 = arith.constant 0 : i32
    %c0_i32_1 = arith.constant 0 : i32
    return %c0_i32, %c0_i32_0 : i32, i32
  }
  func.func @transform_4(%arg0: i32, %arg1: i32) -> (i32, i32) {
    %c0_i32 = arith.constant 0 : i32
    %c0_i32_0 = arith.constant 0 : i32
    return %c0_i32, %arg1 : i32, i32
  }
  func.func @transform_5(%arg0: i32, %arg1: i32) -> (i32, i32) {
    %c0_i32 = arith.constant 0 : i32
    %c0_i32_0 = arith.constant 0 : i32
    return %arg1, %c0_i32 : i32, i32
  }
  func.func @transform_6(%arg0: i32, %arg1: i32) -> (i32, i32) {
    %c0_i32 = arith.constant 0 : i32
    %c0_i32_0 = arith.constant 0 : i32
    return %arg0, %c0_i32 : i32, i32
  }
}

</mosaic_0001>

<bundles_post_ra>
// kernel: tpu_custom_call.1
= control target key start
LH: loop header
LB: loop body
LE: loop exit
PB: predicated region body
PF: predicated region fallthrough
CT: control target
= control target key end

     0   :  { %s977_s0 = inlined_call_operand.hbm [shape: f32[16,128], index: 0, kind: input, shape index: {}]   ;;  %s978_s1 = inlined_call_operand.hbm [shape: f32[8,256], index: 1, kind: input, shape index: {}]   ;;  %s979_s2 = inlined_call_operand.hbm [shape: f32[16,256], index: 2, kind: output, shape index: {}]  }
   0x1   :  { %991 = sst [smem:[#allocation17_spill]] %s977_s0 }
   0x2   :  { %7 = vsyncpa [#allocation3], 0 }
   0x3   :  { %8 = vsyncpa [#allocation6], 0 }
   0x4   :  { %10 = vsyncpa [#allocation6 + $0x1], 0 }
   0x5   :  { %11 = vsyncpa [#allocation4], 0 }
   0x6   :  { %13 = vsyncpa [#allocation4 + $0x1], 0  ;;  %s688_s9 = smov 0   ;;  %s690_s10 = smov 0  }
   0x7   :  { %s692_s11 = smov 0   ;;  %s694_s12 = smov 0  }
   0x8   :  { %s696_s13 = smov 0   ;;  %s698_s14 = smov 0  }
   0x9   :  { %s700_s15 = smov 0   ;;  %s702_s16 = smov 0  }
   0xa   :  { %s704_s17 = smov 0   ;;  %s706_s18 = smov 0  }
   0xb   :  { %s708_s19 = smov 0   ;;  %s710_s20 = smov 0  }
   0xc   :  { %s712_s21 = smov 0   ;;  %s714_s22 = smov 0  }
   0xd LB: > { %992 = sst [smem:[#allocation11_spill]] %s616_s9  ;;  %s310_s23 = sadd.s32 4294967295, %s668_s22   ;;  %s668_s22 = sphi %s714_s22, %s19_s22   ;;  %s664_s21 = sphi %s712_s21, %s1018_s21   ;;  %s660_s20 = sphi %s710_s20, %s1028_s20   ;;  %s656_s19 = sphi %s708_s19, %s1016_s19   ;;  %s652_s18 = sphi %s706_s18, %s1027_s18   ;;  %s648_s17 = sphi %s704_s17, %s1026_s17   ;;  %s644_s16 = sphi %s702_s16, %s1025_s16   ;;  %s640_s15 = sphi %s700_s15, %s1015_s15   ;;  %s636_s14 = sphi %s698_s14, %s1024_s14   ;;  %s632_s13 = sphi %s696_s13, %s1023_s13   ;;  %s628_s12 = sphi %s694_s12, %s1022_s12   ;;  %s624_s11 = sphi %s692_s11, %s1021_s11   ;;  %s620_s10 = sphi %s690_s10, %s1020_s10   ;;  %s616_s9 = sphi %s688_s9, %s1019_s9  }
   0xe   : > { %993 = sst [smem:[#allocation12_spill]] %s644_s16  ;;  %s311_s24 = sadd.s32 4294967294, %s668_s22  }
   0xf   : > { %994 = sst [smem:[#allocation13_spill]] %s664_s21  ;;  %p51_p0 = scmp.ne.s32.totalorder %s644_s16, %s640_s15 }
  0x10   : > { %p52_p1 = scmp.eq.s32.totalorder %s310_s23, 0  ;;  %p77_p2 = scmp.ne.s32.totalorder %s632_s13, %s628_s12 }
  0x11   : > { %p102_p3 = scmp.ne.s32.totalorder %s624_s11, %s620_s10  ;;  %p103_p5 = scmp.eq.s32.totalorder %s310_s23, 3 }
  0x12   : > { %p760_p4 = por %p52_p1, %p51_p0  ;;  %p764_p6 = por %p77_p2, %p52_p1 }
  0x13   : > { %p108_p7 = scmp.ne.s32.totalorder %s620_s10, %s616_s9  ;;  %p770_p8 = por %p103_p5, %p102_p3 }
  0x14   : > { %s995_s25 = scalar_select %p760_p4, 1, 0 }
  0x15   : > { %s996_s26 = scalar_select %p764_p6, 1, 0 }
  0x16   : > { %s997_s27 = scalar_select %p770_p8, 1, 0 }
  0x17   : > { %p109_p9 = scmp.eq.s32.totalorder %s311_s24, 3  ;;  %p312_p10 = scmp.ge.s32.totalorder %s668_s22, 1 }
  0x18   : > { %p116_p11 = scmp.lt.s32.totalorder %s668_s22, 5  ;;  %s313_s29 = sshll.u32 %s656_s19, 7 }
  0x19   : > { %p776_p12 = por %p109_p9, %p108_p7  ;;  %s1001_s0 = sld [smem:[#allocation17_spill]] }
  0x1a   : > { %p781_p13 = pnand %p312_p10, %p116_p11  ;;  %s670_s6 = smov [#allocation2]  }
  0x1b   : > { %s998_s28 = scalar_select %p776_p12, 1, 0 }
  0x1c   : > { %s1000_s30 = scalar_select %p781_p13, 1, 0 }
  0x1d   : > { %999 = sst [smem:[#allocation14_spill]] %s998_s28  ;;  %p331_p0 = pneg %p781_p13 }
  0x1e   : > { %s131_s7 = sshll.u32 %s670_s6, 4  ;;  %s132_s7 = int_to_ptr.vmem [resolvable:$true] %s131_s7 }
  0x1f   : > { %s129_s5 = scalar_lea.hbm %s1001_s0, %s313_s29  ;;  %p792_p1 = pnand %p331_p0, %p760_p4 }
  0x20   : > { %s458_s12 = scalar_lea.hbm %s129_s5, 128  ;;  %s463_s24 = scalar_lea.hbm %s1001_s0, 256 }
  0x21   : > { %p459_p2 = scmp.ne.s32.totalorder %s129_s5, %s458_s12  ;;  %p460_p3 = pneg %p792_p1 }
  0x22   : > { %p464_p9 = scmp.lt.u32.totalorder %s129_s5, %s1001_s0  ;;  %p465_p10 = scmp.lt.u32.totalorder %s463_s24, %s458_s12 }
  0x23   : > { %p461_p5 = pnand %p460_p3, %p459_p2  ;;  %p467_p0 = scmp.lt.u32.totalorder %s458_s12, %s129_s5 }
  0x24   : > { %p466_p11 = por %p465_p10, %p464_p9 }
  0x25   : > { %p462_p7 = pneg %p461_p5 }
  0x26   : > { %p468_p12 = por %p467_p0, %p466_p11 }
  0x28   : > { %p469_p8 = pnand %p468_p12, %p462_p7 }
  0x2a   : > { %472 = shalt.err (!%p469_p8)
}
  0x2b   : > { %s473_s4 = scalar_lea.vmem %s132_s7, 128  ;;  %p481_p4 = scmp.lt.s32.totalorder %s132_s7, %s132_s7 }
  0x2c   : > { %p474_p6 = scmp.ne.s32.totalorder %s132_s7, %s473_s4  ;;  %p482_p13 = scmp.lt.s32.totalorder %s473_s4, %s473_s4 }
  0x2e   : > { %p476_p2 = pnand %p474_p6, %p460_p3  ;;  %p483_p9 = por %p482_p13, %p481_p4 }
  0x30   : > { %p477_p5 = pneg %p476_p2 }
  0x32   : > { %p484_p10 = pnand %p483_p9, %p477_p5 }
  0x34   : > { %487 = shalt.err (!%p484_p10)
}
  0x35   : > { %334 = dma.hbm_to_vmem [thread:$0]  (!%p792_p1), %s129_s5, 128, %s132_s7, [#allocation3]  }
  0x36   : > { %s28_s6 = sadd.s32 1, %s660_s20  ;;  %s31_s12 = sadd.s32 1, %s664_s21 }
  0x37   : > { %p29_p6 = scmp.ge.s32.totalorder %s28_s6, 2  ;;  %s38_s15 = sadd.s32 1, %s648_s17 }
  0x38   : > { %s64_s23 = sadd.s32 1, %s636_s14  ;;  %p71_p4 = scmp.ne.s32.totalorder %s636_s14, %s632_s13 }
  0x39   : > { %s1030_s6 = smov (%p29_p6, %s28_s6), 0  ;;  %s1032_s12 = smov (!%p29_p6, %s31_s12), %s664_s21 }
  0x3a   : > { %1003 = sst [smem:[#allocation15_spill]] %s1030_s6  ;;  %s61_s8 = ssub.s32 %s660_s20, %s1030_s6 }
  0x3b   : > { %p33_p8 = scmp.ge.s32.totalorder %s1032_s12, 2  ;;  %p62_p12 = scmp.eq.s32.totalorder %s61_s8, 0 }
  0x3c   : > { %p72_p13 = scmp.eq.s32.totalorder %s668_s22, 0  ;;  %s92_s5 = sadd.s32 1, %s624_s11 }
  0x3d   : > { %s1034_s12 = smov (%p33_p8, %s1032_s12), 0  ;;  %p343_p11 = scmp.lt.s32.totalorder %s668_s22, 4 }
  0x3e   : > { %1004 = sst [smem:[#allocation16_spill]] %s1034_s12  ;;  %s35_s24 = ssub.s32 %s664_s21, %s1034_s12 }
  0x3f   : > { %s828_s7 = scalar_select %p62_p12, %s636_s14, %s64_s23  }
  0x40   : > { %p832_p1 = por %p72_p13, %p71_p4  ;;  %p36_p3 = scmp.eq.s32.totalorder %s35_s24, 0 }
  0x41   : > { %s89_s3 = sor.u32 %s61_s8, %s35_s24  ;;  %s142_s6 = sand.u32 1, %s636_s14  }
  0x42   : > { %p90_p7 = scmp.eq.s32.totalorder %s89_s3, 0  ;;  %s316_s16 = sshll.u32 %s660_s20, 7 }
  0x43   : > { %s838_s4 = scalar_select %p36_p3, %s648_s17, %s38_s15  }
  0x44   : > { %s841_s0 = scalar_select %p90_p7, %s624_s11, %s92_s5  }
  0x45   : > { %s315_s28 = sshll.u32 %s142_s6, 3  ;;  %s848_s12 = scalar_lea.hbm %s978_s1, %s316_s16 }
  0x46   : > { %s146_s21 = scalar_lea.vmem [#allocation5], %s315_s28  ;;  %p852_p0 = pnand %p343_p11, %p832_p1 }
  0x47   : > { %s153_s8 = sshll.u32 %s146_s21, 4  ;;  %s143_s5 = scalar_lea.sflag [#allocation6], %s142_s6  ;;  %s856_s8 = int_to_ptr.vmem [resolvable:$true] %s153_s8 }
  0x48   : > { %s488_s24 = scalar_lea.hbm %s848_s12, 128  ;;  %p490_p5 = pneg %p852_p0 }
  0x49   : > { %p489_p2 = scmp.ne.s32.totalorder %s848_s12, %s488_s24  ;;  %s493_s21 = scalar_lea.hbm %s978_s1, 256 }
  0x4a   : > { %p494_p6 = scmp.lt.u32.totalorder %s848_s12, %s978_s1  ;;  %p495_p4 = scmp.lt.u32.totalorder %s493_s21, %s488_s24 }
  0x4b   : > { %p491_p9 = pnand %p490_p5, %p489_p2  ;;  %p497_p12 = scmp.lt.u32.totalorder %s488_s24, %s848_s12 }
  0x4c   : > { %p496_p8 = por %p495_p4, %p494_p6 }
  0x4d   : > { %p492_p10 = pneg %p491_p9 }
  0x4e   : > { %p498_p13 = por %p497_p12, %p496_p8 }
  0x50   : > { %p499_p1 = pnand %p498_p13, %p492_p10 }
  0x52   : > { %502 = shalt.err (!%p499_p1)
}
  0x53   : > { %s503_s6 = scalar_lea.vmem %s856_s8, 128  ;;  %s671_s3 = smov [#allocation5]  }
  0x54   : > { %p504_p3 = scmp.ne.s32.totalorder %s856_s8, %s503_s6  ;;  %s508_s23 = sshll.u32 %s671_s3, 4  ;;  %s509_s23 = int_to_ptr.vmem [resolvable:$false] %s508_s23 }
  0x55   : > { %s510_s9 = scalar_lea.vmem %s509_s23, 256  ;;  %p511_p2 = scmp.lt.s32.totalorder %s856_s8, %s509_s23 }
  0x56   : > { %p506_p7 = pnand %p504_p3, %p490_p5  ;;  %p512_p9 = scmp.lt.s32.totalorder %s510_s9, %s503_s6 }
  0x58   : > { %p507_p11 = pneg %p506_p7  ;;  %p513_p6 = por %p512_p9, %p511_p2 }
  0x5a   : > { %p514_p4 = pnand %p513_p6, %p507_p11 }
  0x5c   : > { %517 = shalt.err (!%p514_p4)
}
  0x5d   : > { %338 = dma.hbm_to_vmem [thread:$0]  (!%p852_p0), %s848_s12, 128, %s856_s8, %s143_s5  }
  0x5e   : > { %p1007_p10 = scmp.ne.s32.totalorder %s1000_s30, 0 }
  0x5f   : > { %p1008_p5 = scmp.ne.s32.totalorder (!%p1007_p10), %s995_s25, 0 }
  0x60   : > { %162 = sbr.rel (%p1007_p10) target bundleno = 136 (0x88), region = 28 }
  0x67   : > { %603 = dma.done.wait (%p1008_p5), [#allocation3], 128  }
  0x68   : > { %605 = vsyncadd (%p1008_p5), [#allocation3], 4294967168  ;;  %s168_s24 = sand.u32 1, %s632_s13   ;;  %p1009_p8 = scmp.ne.s32.totalorder %s996_s26, 0 }
  0x69   : > { %s318_s16 = sshll.u32 %s168_s24, 3  ;;  %s169_s21 = scalar_lea.sflag [#allocation6], %s168_s24 }
  0x6a   : > { %s172_s28 = scalar_lea.vmem [#allocation5], %s318_s16 }
  0x6b   : > { %607 = dma.done.wait (%p1009_p8), %s169_s21, 128  }
  0x6c   : > { %609 = vsyncadd (%p1009_p8), %s169_s21, 4294967168  ;;  %s190_s30 = sand.u32 1, %s620_s10   ;;  %s321_s12 = sshll.u32 %s656_s19, 1  ;;  %v193_v0 = vld [vmem:[#allocation2] sm:$0xff]  ;;  %v194_v1 = vld [vmem:[%s172_s28] sm:$0xff] }
  0x6d   : > { %s319_s8 = sshll.u32 %s190_s30, 3  ;;  %s209_s25 = sadd.s32 %s652_s18, %s321_s12  ;;  %v195_v2 = vadd.f32 %v194_v1, %v193_v0 }
  0x6e   : > { %s192_s15 = scalar_lea.vmem [#allocation7], %s319_s8  ;;  %s322_s29 = sshll.u32 %s209_s25, 7 }
  0x6f   : > { %s213_s5 = sshll.u32 %s192_s15, 4  ;;  %s902_s26 = scalar_lea.hbm %s979_s2, %s322_s29  ;;  %196 = vst [vmem:[%s192_s15] sm:$0xff] %v195_v2  ;;  %s897_s5 = int_to_ptr.vmem [resolvable:$true] %s213_s5 }
  0x70   : > { %s198_s19 = scalar_lea.sflag [#allocation4], %s190_s30  ;;  %s518_s23 = scalar_lea.vmem %s897_s5, 128 }
  0x71   : > { %p519_p0 = scmp.ne.s32.totalorder %s897_s5, %s518_s23  ;;  %p1010_p12 = scmp.ne.s32.totalorder %s997_s27, 0 }
  0x72   : > { %s672_s18 = smov [#allocation7]  }
  0x73   : > { %p520_p13 = pnand %p519_p0, %p1010_p12  ;;  %s522_s9 = sshll.u32 %s672_s18, 4  ;;  %s523_s9 = int_to_ptr.vmem [resolvable:$false] %s522_s9 }
  0x74   : > { %s524_s24 = scalar_lea.vmem %s523_s9, 256  ;;  %p525_p3 = scmp.lt.s32.totalorder %s897_s5, %s523_s9 }
  0x75   : > { %p521_p1 = pneg %p520_p13  ;;  %p526_p7 = scmp.lt.s32.totalorder %s524_s24, %s518_s23 }
  0x77   : > { %p527_p11 = por %p526_p7, %p525_p3 }
  0x79   : > { %p528_p2 = pnand %p527_p11, %p521_p1 }
  0x7b   : > { %531 = shalt.err (!%p528_p2)
}
  0x7c   : > { %s532_s16 = scalar_lea.hbm %s902_s26, 128  ;;  %s536_s30 = scalar_lea.hbm %s979_s2, 512 }
  0x7d   : > { %p533_p9 = scmp.ne.s32.totalorder %s902_s26, %s532_s16  ;;  %p537_p10 = scmp.lt.u32.totalorder %s902_s26, %s979_s2 }
  0x7e   : > { %p538_p5 = scmp.lt.u32.totalorder %s536_s30, %s532_s16  ;;  %p540_p0 = scmp.lt.u32.totalorder %s532_s16, %s902_s26 }
  0x7f   : > { %p534_p6 = pnand %p533_p9, %p1010_p12 }
  0x80   : > { %p539_p8 = por %p538_p5, %p537_p10 }
  0x81   : > { %p535_p4 = pneg %p534_p6 }
  0x82   : > { %p541_p13 = por %p540_p0, %p539_p8 }
  0x84   : > { %p542_p1 = pnand %p541_p13, %p535_p4 }
  0x86   : > { %545 = shalt.err (!%p542_p1)
}
  0x87   : > { %329 = dma.vmem_to_hbm [thread:$0]  (%p1010_p12), %s897_s5, 128, %s902_s26, %s198_s19  }
  0x88 PF: > { %s1011_s25 = sld [smem:[#allocation11_spill]]  ;;  %s1012_s15 = sld [smem:[#allocation14_spill]] }
  0x89   : > { %p344_p3 = scmp.ge.s32.totalorder %s668_s22, 2 }
  0x8e   : > { %s225_s29 = sand.u32 1, %s1011_s25   ;;  %p1013_p7 = scmp.ne.s32.totalorder %s1012_s15, 0 }
  0x8f   : > { %s226_s6 = scalar_lea.sflag [#allocation4], %s225_s29 }
  0x90   : > { %p340_p11 = pnand %p344_p3, %p1013_p7 }
  0x92   : > { %611 = dma.done.wait (!%p340_p11), %s226_s6, 128  }
  0x93   : > { %613 = vsyncadd (!%p340_p11), %s226_s6, 4294967168  ;;  %s19_s22 = sadd.s32 1, %s668_s22   ;;  %s1015_s15 = sld [smem:[#allocation12_spill]] }
  0x94   : > { %p930_p2 = scmp.ge.s32.totalorder %s19_s22, 6   ;;  %s1016_s19 = sld [smem:[#allocation13_spill]] }
  0x95   : > { %s1017_s27 = sld [smem:[#allocation15_spill]]  ;;  %s1018_s21 = sld [smem:[#allocation16_spill]] }
  0x96   : > { %s1019_s9 = smov %s620_s10  ;;  %s1020_s10 = smov %s624_s11 }
  0x97   : > { %s1021_s11 = smov %s841_s0  ;;  %s1022_s12 = smov %s632_s13 }
  0x98   : > { %s1023_s13 = smov %s636_s14  ;;  %s1024_s14 = smov %s828_s7 }
  0x99   : > { %s1025_s16 = smov %s648_s17  ;;  %s1026_s17 = smov %s838_s4 }
  0x9a   : > { %s1027_s18 = smov %s660_s20  ;;  %18 = sbr.rel (!%p930_p2) target bundleno = 13 (0xd), region = 79 }
  0x9b   : > { %s1028_s20 = smov %s1017_s27 }
  0xa1   :  { %231 = vsyncpa [#allocation3], 1 }
  0xa2   :  { %233 = vsyncpa [#allocation3 + $0x1], 1 }
  0xa3   :  { %234 = vsyncpa [#allocation6], 1 }
  0xa4   :  { %236 = vsyncpa [#allocation6 + $0x1], 1 }
  0xa5   :  { %237 = vsyncpa [#allocation4], 1 }
  0xa6   :  { %239 = vsyncpa [#allocation4 + $0x1], 1 }

// kernel: _lambda_.5
= control target key start
LH: loop header
LB: loop body
LE: loop exit
PB: predicated region body
PF: predicated region fallthrough
CT: control target
= control target key end

     0   :  { %vm24_vm0 = vcmask 261120   ;;  %v146_v8 = vmov 0.0   ;;  %vm147_vm1 = vmmov 0   ;;  %vm47_vm2 = vcmask 257024   ;;  %s195_s0 = inlined_call_operand.vmem [shape: f32[8,32], index: 0, kind: input, shape index: {}]   ;;  %s196_s2 = inlined_call_operand.vmem [shape: bf16[32,32], index: 2, kind: input, shape index: {}]   ;;  %s197_s1 = inlined_call_operand.vmem [shape: f32[1,32], index: 1, kind: input, shape index: {}]   ;;  %s198_s3 = inlined_call_operand.vmem [shape: f32[1,32], index: 3, kind: input, shape index: {}]   ;;  %s199_s4 = inlined_call_operand.vmem [shape: f32[8,32], index: 4, kind: output, shape index: {}]  }
   0x1   :  { %v22_v0 = vld [vmem:[%s195_s0] sm:$0xff]  ;;  %132 = vmatprep.subr.bf16.mxu0 %v146_v8  ;;  %v143_v9 = vld [vmem:[%s196_s2 + $0x8] sm:$0xff]   ;;  %136 = vmatprep.mubr.msk.bf16.mxu0 %vm147_vm1, %v146_v8 }
   0x2   :  { %v25_v1 = vsel %vm24_vm0, %v22_v0, 0.0  ;;  %v142_v7 = vld [vmem:[%s196_s2] sm:$0xff]  }
   0x3   :  { %26 = vadd.xlane.f32.xlu0 %v25_v1  ;;  %133 = vmatpush3.bf16.msra.mxu0 %v142_v7  ;;  %v124_v14 = vld [vmem:[%s197_s1] ss:$0 sm:$0xff] }
   0x4   :  { %134 = vmatprep.subr.bf16.mxu0 %v146_v8  ;;  %v128_v20 = vld [vmem:[%s198_s3] ss:$0 sm:$0xff] }
   0x7   :  { %135 = vmatpush3.bf16.msra.mxu0 %v143_v9 }
  0x90   :  { %v27_v2 = vpop.xlane.xlu0 %26 }
  0x91   :  { %v29_v3 = vmul.f32 0.03125, %v27_v2 }
  0x93   :  { %v30_v4 = vsub.f32 %v22_v0, %v29_v3 }
  0x95   :  { %v31_v5 = vmul.f32 %v30_v4, %v30_v4 }
  0x97   :  { %v32_v6 = vsel %vm24_vm0, %v31_v5, 0.0 }
  0x98   :  { %33 = vadd.xlane.f32.xlu0 %v32_v6 }
 0x125   :  { %v34_v10 = vpop.xlane.xlu0 %33 }
 0x126   :  { %v35_v11 = vmul.f32 0.03125, %v34_v10 }
 0x128   :  { %v36_v12 = vadd.f32 1e-05, %v35_v11 }
 0x12a   :  { %144 = vrsqrt.f32 %v36_v12 }
 0x134   :  { %v145_v13 = vpop.eup %144 }
 0x135   :  { %v38_v15 = vmul.f32 %v145_v13, %v30_v4 }
 0x137   :  { %v45_v16 = vmul.f32 %v124_v14, %v38_v15 }
 0x139   :  { %v46_v17 = vpack.c.bf16 %v45_v16, %v45_v16 }
 0x13b   :  { %48 = vst.msk [vmem:[#allocation2] sm:$0xf] %vm47_vm2, %v46_v17 }
 0x142   :  { %v49_v18 = vld [vmem:[#allocation2] sm:$0xf] }
 0x143   :  { %137 = vmatmul.mubr.msk.bf16.vlgmr.msra.gmra.mrb[0].mxu0 %vm24_vm0, %v49_v18 }
 0x216   :  { %v104_v19 = vpop.f32.mrb[0].mxu0 }
 0x217   :  { %v110_v21 = vmul.f32 0.02, %v104_v19  ;;  %v138_v22 = vpop.f32.mrb[1].mxu0 }
 0x218   :  { %v107_v23 = vpop.f32.mrb[2].mxu0 }
 0x219   :  { %v118_v24 = vadd.f32 %v128_v20, %v110_v21  ;;  %v139_v25 = vpop.f32.mrb[3].mxu0 }
 0x21b   :  { %119 = vst.msk [vmem:[%s199_s4] sm:$0xff] %vm24_vm0, %v118_v24 }

// kernel: _lambda_.9
= control target key start
LH: loop header
LB: loop body
LE: loop exit
PB: predicated region body
PF: predicated region fallthrough
CT: control target
= control target key end

     0   :  { %v134_v1 = vmov 0.0   ;;  %vm135_vm0 = vmmov 0   ;;  %s173_s0 = inlined_call_operand.vmem [shape: f32[8,32], index: 0, kind: input, shape index: {}]   ;;  %s174_s1 = inlined_call_operand.vmem [shape: bf16[32,64], index: 1, kind: input, shape index: {}]   ;;  %s175_s2 = inlined_call_operand.hbm [shape: f32[8,64], index: 2, kind: output, shape index: {}]  }
   0x1   :  { %v108_v0 = vld [vmem:[%s174_s1] sm:$0xff]   ;;  %97 = vmatprep.subr.bf16.mxu0 %v134_v1  ;;  %v109_v2 = vld [vmem:[%s174_s1 + $0x8] sm:$0xff]   ;;  %101 = vmatprep.mubr.msk.bf16.mxu0 %vm135_vm0, %v134_v1 }
   0x2   :  { %98 = vmatpush3.bf16.msra.mxu0 %v108_v0  ;;  %v13_v3 = vld [vmem:[%s173_s0] sm:$0xff] }
   0x3   :  { %7 = vsyncpa [#allocation3], 0  ;;  %99 = vmatprep.subr.bf16.mxu0 %v134_v1  ;;  %v14_v4 = vpack.c.bf16 %v13_v3, %v13_v3  ;;  %vm31_vm1 = vcmask 261120   ;;  %s136_s15 = smov [#allocation2]   ;;  %vm75_vm2 = vcmask 523264  }
   0x4   :  { %s83_s16 = sshll.u32 %s136_s15, 4  ;;  %s84_s16 = int_to_ptr.vmem [resolvable:$true] %s83_s16 }
   0x5   :  { %s110_s1 = scalar_lea.vmem %s84_s16, 128  ;;  %p115_p1 = scmp.lt.s32.totalorder %s84_s16, %s84_s16 }
   0x6   :  { %100 = vmatpush3.bf16.msra.mxu0 %v109_v2  ;;  %p111_p0 = scmp.ne.s32.totalorder %s84_s16, %s110_s1  ;;  %p116_p2 = scmp.lt.s32.totalorder %s110_s1, %s110_s1 }
   0x8   :  { %p117_p3 = por %p116_p2, %p115_p1 }
   0x9   :  { %102 = vmatmul.mubr.msk.bf16.vlgmr.msra.gmra.mrb[0].mxu0 %vm31_vm1, %v14_v4 }
   0xa   :  { %p118_p4 = pnand %p117_p3, %p111_p0 }
  0xdc   :  { %v69_v5 = vpop.f32.mrb[0].mxu0 }
  0xdd   :  { %76 = vst.msk [vmem:[#allocation2] sm:$0xff] %vm75_vm2, %v69_v5  ;;  %v103_v6 = vpop.f32.mrb[1].mxu0 }
  0xde   :  { %v72_v7 = vpop.f32.mrb[2].mxu0 }
  0xdf   :  { %121 = shalt.err (!%p118_p4)
}
  0xe0   :  { %s122_s18 = scalar_lea.hbm %s175_s2, 128 }
  0xe1   :  { %p123_p5 = scmp.ne.s32.totalorder %s175_s2, %s122_s18  ;;  %p126_p6 = scmp.lt.u32.totalorder %s122_s18, %s175_s2 }
  0xe3   :  { %p128_p7 = pnand %p126_p6, %p123_p5 }
  0xe5   :  { %131 = shalt.err (!%p128_p7)
}
  0xe6   :  { %86 = dma.vmem_to_hbm [thread:$0]  %s84_s16, 128, %s175_s2, [#allocation3]   ;;  %v104_v8 = vpop.f32.mrb[3].mxu0 }
  0xe7   :  { %132 = dma.done.wait [#allocation3], 128  }
  0xe8   :  { %133 = vsyncadd [#allocation3], 4294967168 }
  0xe9   :  { %90 = vsyncpa [#allocation3], 1 }

// kernel: _lambda_.6
= control target key start
LH: loop header
LB: loop body
LE: loop exit
PB: predicated region body
PF: predicated region fallthrough
CT: control target
= control target key end

     0   :  { %v380_v0 = vmov 0.0   ;;  %vm381_vm0 = vmmov 0   ;;  %vm46_vm1 = vcmask 261120   ;;  %vm116_vm2 = vcmask 257024   ;;  %s492_s2 = inlined_call_operand.vmem [shape: bf16[32,32], index: 2, kind: input, shape index: {}]   ;;  %s493_s0 = inlined_call_operand.vmem [shape: f32[8,32], index: 0, kind: input, shape index: {}]   ;;  %s494_s1 = inlined_call_operand.vmem [shape: f32[8,32], index: 1, kind: input, shape index: {}, may-alias: {1,6}]   ;;  %s495_s6 = inlined_call_operand.vmem [shape: f32[8,32], index: 6, kind: output, shape index: {}, may-alias: {1,6}]   ;;  %s496_s4 = inlined_call_operand.vmem [shape: bf16[32,128], index: 4, kind: input, shape index: {}]   ;;  %s497_s5 = inlined_call_operand.vmem [shape: bf16[128,32], index: 5, kind: input, shape index: {}]   ;;  %s498_s3 = inlined_call_operand.vmem [shape: f32[1,32], index: 3, kind: input, shape index: {}]  }
   0x1   :  { %326 = vmatprep.subr.bf16.mxu1 %v380_v0  ;;  %v364_v1 = vld [vmem:[%s492_s2] sm:$0xff]   ;;  %330 = vmatprep.mubr.msk.bf16.mxu1 %vm381_vm0, %v380_v0  ;;  %v365_v2 = vld [vmem:[%s492_s2 + $0x8] sm:$0xff]   ;;  %v370_v21 = vld [vmem:[%s497_s5 + $0x10] sm:$0xff]  }
   0x2   :  { %342 = vmatprep.subr.bf16.mxu0 %v380_v0  ;;  %358 = vmatprep.mubr.msk.bf16.mxu0 %vm381_vm0, %v380_v0  ;;  %v28_v3 = vld [vmem:[%s493_s0] sm:$0xff]  ;;  %v367_v18 = vld [vmem:[%s496_s4 + $0x8] sm:$0xff]   ;;  %v371_v31 = vld [vmem:[%s497_s5 + $0x18] sm:$0xff]  }
   0x3   :  { %327 = vmatpush3.bf16.msra.mxu1 %v364_v1  ;;  %v29_v4 = vpack.c.bf16 %v28_v3, %v28_v3  ;;  %v90_v5 = vld [vmem:[%s494_s1] sm:$0xff]  ;;  %v369_v20 = vld [vmem:[%s497_s5 + $0x8] sm:$0xff]   ;;  %v374_v34 = vld [vmem:[%s497_s5 + $0x30] sm:$0xff]  }
   0x4   :  { %328 = vmatprep.subr.bf16.mxu1 %v380_v0  ;;  %v366_v17 = vld [vmem:[%s496_s4] sm:$0xff]   ;;  %v373_v33 = vld [vmem:[%s497_s5 + $0x28] sm:$0xff]   ;;  %v375_v35 = vld [vmem:[%s497_s5 + $0x38] sm:$0xff]  }
   0x5   :  { %v368_v19 = vld [vmem:[%s497_s5] sm:$0xff]  }
   0x6   :  { %343 = vmatpush3.bf16.msra.mxu0 %v368_v19  ;;  %v299_v26 = vld [vmem:[%s498_s3] ss:$0 sm:$0xff] }
   0x7   :  { %329 = vmatpush3.bf16.msra.mxu1 %v365_v2  ;;  %344 = vmatprep.subr.bf16.mxu0 %v380_v0  ;;  %v372_v32 = vld [vmem:[%s497_s5 + $0x20] sm:$0xff]  }
   0x8   :  { %334 = vmatprep.subr.bf16.mxu1 %v380_v0 }
   0xa   :  { %331 = vmatmul.mubr.msk.bf16.vlgmr.msra.gmra.mrb[0].mxu1 %vm46_vm1, %v29_v4  ;;  %345 = vmatpush3.bf16.msra.mxu0 %v369_v20 }
   0xb   :  { %338 = vmatprep.mubr.msk.bf16.mxu1 %vm381_vm0, %v380_v0  ;;  %335 = vmatpush3.bf16.msra.mxu1 %v366_v17 }
   0xc   :  { %336 = vmatprep.subr.bf16.mxu1 %v380_v0  ;;  %346 = vmatprep.subr.bf16.mxu0 %v380_v0 }
   0xe   :  { %347 = vmatpush3.bf16.msra.mxu0 %v370_v21 }
   0xf   :  { %337 = vmatpush3.bf16.msra.mxu1 %v367_v18  ;;  %348 = vmatprep.subr.bf16.mxu0 %v380_v0 }
  0x12   :  { %349 = vmatpush3.bf16.msra.mxu0 %v371_v31 }
  0x13   :  { %350 = vmatprep.subr.bf16.mxu0 %v380_v0 }
  0x16   :  { %351 = vmatpush3.bf16.msra.mxu0 %v372_v32 }
  0x17   :  { %352 = vmatprep.subr.bf16.mxu0 %v380_v0 }
  0x1a   :  { %353 = vmatpush3.bf16.msra.mxu0 %v373_v33 }
  0x1b   :  { %354 = vmatprep.subr.bf16.mxu0 %v380_v0 }
  0x1e   :  { %355 = vmatpush3.bf16.msra.mxu0 %v374_v34 }
  0x1f   :  { %356 = vmatprep.subr.bf16.mxu0 %v380_v0 }
  0x22   :  { %357 = vmatpush3.bf16.msra.mxu0 %v375_v35 }
  0xdd   :  { %v84_v6 = vpop.f32.mrb[0].mxu1 }
  0xde   :  { %v91_v7 = vadd.f32 %v90_v5, %v84_v6  ;;  %v332_v8 = vpop.f32.mrb[1].mxu1 }
  0xdf   :  { %v87_v9 = vpop.f32.mrb[2].mxu1 }
  0xe0   :  { %v333_v10 = vpop.f32.mrb[3].mxu1  ;;  %v94_v11 = vsel %vm46_vm1, %v91_v7, 0.0  ;;  %92 = vst.msk [vmem:[%s495_s6] sm:$0xff] %vm46_vm1, %v91_v7 }
  0xe1   :  { %95 = vadd.xlane.f32.xlu0 %v94_v11 }
  0xe7   :  { %v184_v46 = vld [vmem:[%s495_s6] sm:$0xff] }
 0x16e   :  { %v96_v12 = vpop.xlane.xlu0 %95 }
 0x16f   :  { %v98_v13 = vmul.f32 0.03125, %v96_v12 }
 0x171   :  { %v99_v14 = vsub.f32 %v91_v7, %v98_v13 }
 0x173   :  { %v100_v15 = vmul.f32 %v99_v14, %v99_v14 }
 0x175   :  { %v101_v16 = vsel %vm46_vm1, %v100_v15, 0.0 }
 0x176   :  { %102 = vadd.xlane.f32.xlu0 %v101_v16 }
 0x203   :  { %v103_v22 = vpop.xlane.xlu0 %102 }
 0x204   :  { %v104_v23 = vmul.f32 0.03125, %v103_v22 }
 0x206   :  { %v105_v24 = vadd.f32 1e-05, %v104_v23 }
 0x208   :  { %376 = vrsqrt.f32 %v105_v24 }
 0x212   :  { %v377_v25 = vpop.eup %376 }
 0x213   :  { %v107_v27 = vmul.f32 %v377_v25, %v99_v14 }
 0x215   :  { %v114_v28 = vmul.f32 %v299_v26, %v107_v27 }
 0x217   :  { %v115_v29 = vpack.c.bf16 %v114_v28, %v114_v28 }
 0x219   :  { %117 = vst.msk [vmem:[#allocation2] sm:$0xf] %vm116_vm2, %v115_v29 }
 0x220   :  { %v118_v30 = vld [vmem:[#allocation2] sm:$0xf] }
 0x221   :  { %339 = vmatmul.mubr.msk.bf16.vlgmr.msra.gmra.mrb[4].mxu1 %vm46_vm1, %v118_v30 }
 0x2f4   :  { %v173_v36 = vpop.f32.mrb[4].mxu1 }
 0x2f5   :  { %v180_v37 = vmul.f32 0.70710677, %v173_v36  ;;  %v340_v38 = vpop.f32.mrb[5].mxu1  ;;  %v179_v42 = vmul.f32 0.5, %v173_v36 }
 0x2f6   :  { %v176_v39 = vpop.f32.mrb[6].mxu1 }
 0x2f7   :  { %378 = verf.f32 %v180_v37  ;;  %v341_v40 = vpop.f32.mrb[7].mxu1 }
 0x301   :  { %v379_v41 = vpop.eup %378 }
 0x302   :  { %v182_v43 = vadd.f32 1.0, %v379_v41 }
 0x304   :  { %v183_v44 = vmul.f32 %v182_v43, %v179_v42 }
 0x306   :  { %v185_v45 = vpack.c.bf16 %v183_v44, %v183_v44 }
 0x308   :  { %359 = vmatmul.mubr.bf16.vlgmr.msra.gmra.mrb[0].mxu0 %v185_v45 }
 0x3db   :  { %v284_v47 = vpop.f32.mrb[0].mxu0 }
 0x3dc   :  { %v290_v48 = vadd.f32 %v284_v47, %v184_v46  ;;  %v360_v49 = vpop.f32.mrb[1].mxu0 }
 0x3dd   :  { %v287_v50 = vpop.f32.mrb[2].mxu0 }
 0x3de   :  { %291 = vst.msk [vmem:[%s495_s6] sm:$0xff] %vm46_vm1, %v290_v48  ;;  %v361_v51 = vpop.f32.mrb[3].mxu0 }

</bundles_post_ra>
